<compile_context>
chip_gen: v7x
topology: tpu7x:2x2x1
jax: 0.10.0
libtpu: 0.0.40
codegen_flags: <defaults>
</compile_context>

<pallas_src>
import jax
import jax.numpy as jnp
from jax.experimental import pallas as pl
from jax.experimental.pallas import tpu as pltpu

INPUT_SIZE = 34
HIDDEN_SIZE = 256
NUM_CLASSES = 2
DEFAULT_TILE_B = 4096  # ~12 MB double-buffered footprint -> fits 32 MiB scoped VMEM


def mlp_kernel(x_ref, w1_ref, b1_ref, w2_ref, b2_ref, o_ref):
    # Layer 1 on the MXU in f32 (exact fidelity with the PyTorch module; the
    # kernel is HBM-bound so f32 MXU passes are free).
    h = jnp.dot(x_ref[...], w1_ref[...], preferred_element_type=jnp.float32)
    h = jnp.maximum(h + b1_ref[...], 0.0)
    # Layer 2: (tile, 256) x (256, 2). The 2-wide store is a masked vst;
    # negligible (tile/8 vregs per step) vs. the HBM bytes it saves.
    out = jnp.dot(h, w2_ref[...], preferred_element_type=jnp.float32)
    o_ref[...] = (out + b2_ref[...]).astype(o_ref.dtype)


def neural_net_forward(x, w1_t, b1, w2_t, b2, *, tile_b=DEFAULT_TILE_B):
    """x: (B, 34) f32; w1_t: (34, 256); b1: (256,); w2_t: (256, 2); b2: (2,)."""
    batch = x.shape[0]

    # Tile is a multiple of 8 (sublane constraint) but no larger than needed.
    tile = min(tile_b, 8 * pl.cdiv(batch, 8))
    grid = (pl.cdiv(batch, tile),)  # ragged last block handled by Pallas masking

    b1_row = b1.reshape(1, HIDDEN_SIZE).astype(jnp.float32)
    b2_row = b2.reshape(1, NUM_CLASSES).astype(jnp.float32)

    weight_bytes = 4 * (w1_t.size + b1_row.size + w2_t.size + b2_row.size)
    cost = pl.CostEstimate(
        flops=2 * batch * INPUT_SIZE * HIDDEN_SIZE
        + 2 * batch * HIDDEN_SIZE * NUM_CLASSES,
        transcendentals=0,
        bytes_accessed=batch * INPUT_SIZE * 4        # f32 x stream
        + batch * NUM_CLASSES * 4                    # narrow f32 output
        + weight_bytes,
    )

    return pl.pallas_call(
        mlp_kernel,
        out_shape=jax.ShapeDtypeStruct((batch, NUM_CLASSES), jnp.float32),
        grid=grid,
        in_specs=[
            pl.BlockSpec((tile, INPUT_SIZE), lambda i: (i, 0)),         # x: batch-tiled
            pl.BlockSpec((INPUT_SIZE, HIDDEN_SIZE), lambda i: (0, 0)),  # weights resident
            pl.BlockSpec((1, HIDDEN_SIZE), lambda i: (0, 0)),
            pl.BlockSpec((HIDDEN_SIZE, NUM_CLASSES), lambda i: (0, 0)),
            pl.BlockSpec((1, NUM_CLASSES), lambda i: (0, 0)),
        ],
        out_specs=pl.BlockSpec((tile, NUM_CLASSES), lambda i: (i, 0)),
        compiler_params=pltpu.CompilerParams(
            # Batch tiles are independent -> shard across v7x's 2 TensorCores.
            dimension_semantics=("parallel",),
            # Raise v5e's 16 MiB scoped default; 32 MiB is the v6e/v7x default
            # and comfortably holds the ~12 MB footprint at tile=4096.
            vmem_limit_bytes=32 * 1024 * 1024,
        ),
        cost_estimate=cost,
    )(x, w1_t.astype(jnp.float32), b1_row, w2_t.astype(jnp.float32), b2_row)


def init_params(key):
    """Deterministic synthetic init mirroring nn.Linear's uniform(-1/sqrt(fan_in), +)."""
    k1, k2, k3, k4 = jax.random.split(key, 4)
    bound1 = 1.0 / jnp.sqrt(jnp.float32(INPUT_SIZE))
    bound2 = 1.0 / jnp.sqrt(jnp.float32(HIDDEN_SIZE))
    # PyTorch stores (out, in); we build directly in transposed (in, out) layout.
    w1_t = jax.random.uniform(k1, (INPUT_SIZE, HIDDEN_SIZE), jnp.float32, -bound1, bound1)
    b1 = jax.random.uniform(k2, (HIDDEN_SIZE,), jnp.float32, -bound1, bound1)
    w2_t = jax.random.uniform(k3, (HIDDEN_SIZE, NUM_CLASSES), jnp.float32, -bound2, bound2)
    b2 = jax.random.uniform(k4, (NUM_CLASSES,), jnp.float32, -bound2, bound2)
    return w1_t, b1, w2_t, b2


def _reference(x, w1_t, b1, w2_t, b2):
    h = jnp.maximum(jnp.dot(x, w1_t, precision=jax.lax.Precision.HIGHEST) + b1, 0.0)
    return jnp.dot(h, w2_t, precision=jax.lax.Precision.HIGHEST) + b2


if __name__ == "__main__":
    key = jax.random.PRNGKey(0)
    k_x, k_x2, k_p = jax.random.split(key, 3)
    w1_t, b1, w2_t, b2 = init_params(k_p)

    # Small aligned batch.
    batch = 8
    x = jax.random.normal(k_x, (batch, INPUT_SIZE), jnp.float32)
    out = jax.block_until_ready(neural_net_forward(x, w1_t, b1, w2_t, b2))
    assert out.shape == (batch, NUM_CLASSES)
    assert jnp.allclose(out, _reference(x, w1_t, b1, w2_t, b2), atol=5e-3, rtol=5e-3)

    # Ragged batch (exercises the masked boundary block path).
    batch2 = 13
    x2 = jax.random.normal(k_x2, (batch2, INPUT_SIZE), jnp.float32)
    out2 = jax.block_until_ready(neural_net_forward(x2, w1_t, b1, w2_t, b2))
    assert out2.shape == (batch2, NUM_CLASSES)
    assert jnp.allclose(out2, _reference(x2, w1_t, b1, w2_t, b2), atol=5e-3, rtol=5e-3)

    print("KERNEL_OK")
</pallas_src>

<mosaic_0001>
module attributes {stable_mosaic.version = 11 : i64} {
  func.func @mlp_kernel(%arg0: i32, %arg1: memref<8x34xf32, #tpu.memory_space<vmem>>, %arg2: memref<34x256xf32, #tpu.memory_space<vmem>>, %arg3: memref<1x256xf32, #tpu.memory_space<vmem>>, %arg4: memref<256x2xf32, #tpu.memory_space<vmem>>, %arg5: memref<1x2xf32, #tpu.memory_space<vmem>>, %arg6: memref<8x2xf32, #tpu.memory_space<vmem>>) attributes {dimension_semantics = [#tpu.dimension_semantics<parallel>], iteration_bounds = array<i64: 1>, scalar_prefetch = 0 : i64, scratch_operands = 0 : i64, tpu.core_type = #tpu.core_type<tc>, window_params = [{transform_indices = @transform_0, window_bounds = array<i64: 8, 34>}, {pipeline_mode = #tpu.pipeline_mode<synchronous>, transform_indices = @transform_1, window_bounds = array<i64: 34, 256>}, {pipeline_mode = #tpu.pipeline_mode<synchronous>, transform_indices = @transform_2, window_bounds = array<i64: 1, 256>}, {pipeline_mode = #tpu.pipeline_mode<synchronous>, transform_indices = @transform_3, window_bounds = array<i64: 256, 2>}, {pipeline_mode = #tpu.pipeline_mode<synchronous>, transform_indices = @transform_4, window_bounds = array<i64: 1, 2>}, {transform_indices = @transform_5, window_bounds = array<i64: 8, 2>}]} {
    %c0 = arith.constant 0 : index
    %c0_0 = arith.constant 0 : index
    %0 = vector.load %arg1[%c0, %c0_0] : memref<8x34xf32, #tpu.memory_space<vmem>>, vector<8x34xf32>
    %c0_1 = arith.constant 0 : index
    %c0_2 = arith.constant 0 : index
    %1 = vector.load %arg2[%c0_1, %c0_2] : memref<34x256xf32, #tpu.memory_space<vmem>>, vector<34x256xf32>
    %cst = arith.constant dense<0.000000e+00> : vector<8x256xf32>
    %2 = tpu.matmul %0, %1, %cst {dimension_numbers = #tpu.dot_dimension_numbers<[1], [0], [0], [1], [0, 0, 1, 1], [], []>} : vector<8x34xf32>, vector<34x256xf32>, vector<8x256xf32> -> vector<8x256xf32>
    %c0_3 = arith.constant 0 : index
    %c0_4 = arith.constant 0 : index
    %3 = vector.load %arg3[%c0_3, %c0_4] : memref<1x256xf32, #tpu.memory_space<vmem>>, vector<1x256xf32>
    %4 = vector.broadcast %3 : vector<1x256xf32> to vector<8x256xf32>
    %5 = arith.addf %2, %4 : vector<8x256xf32>
    %cst_5 = arith.constant 0.000000e+00 : f32
    %6 = vector.broadcast %cst_5 : f32 to vector<8x256xf32>
    %7 = arith.maximumf %5, %6 : vector<8x256xf32>
    %c0_6 = arith.constant 0 : index
    %c0_7 = arith.constant 0 : index
    %8 = vector.load %arg4[%c0_6, %c0_7] : memref<256x2xf32, #tpu.memory_space<vmem>>, vector<256x2xf32>
    %cst_8 = arith.constant dense<0.000000e+00> : vector<8x2xf32>
    %9 = tpu.matmul %7, %8, %cst_8 {dimension_numbers = #tpu.dot_dimension_numbers<[1], [0], [0], [1], [0, 0, 1, 1], [], []>} : vector<8x256xf32>, vector<256x2xf32>, vector<8x2xf32> -> vector<8x2xf32>
    %c0_9 = arith.constant 0 : index
    %c0_10 = arith.constant 0 : index
    %10 = vector.load %arg5[%c0_9, %c0_10] : memref<1x2xf32, #tpu.memory_space<vmem>>, vector<1x2xf32>
    %11 = vector.broadcast %10 : vector<1x2xf32> to vector<8x2xf32>
    %12 = arith.addf %9, %11 : vector<8x2xf32>
    %c0_11 = arith.constant 0 : index
    %c0_12 = arith.constant 0 : index
    %13 = vector.load %arg6[%c0_11, %c0_12] : memref<8x2xf32, #tpu.memory_space<vmem>>, vector<8x2xf32>
    tpu.vector_store %arg6[%c0_11, %c0_12], %12 {strides = array<i32>} : memref<8x2xf32, #tpu.memory_space<vmem>>, vector<8x2xf32>,
    return
  }
  func.func @transform_0(%arg0: i32) -> (i32, i32) {
    %c0_i32 = arith.constant 0 : i32
    %c0_i32_0 = arith.constant 0 : i32
    return %arg0, %c0_i32 : i32, i32
  }
  func.func @transform_1(%arg0: i32) -> (i32, i32) {
    %c0_i32 = arith.constant 0 : i32
    %c0_i32_0 = arith.constant 0 : i32
    %c0_i32_1 = arith.constant 0 : i32
    return %c0_i32, %c0_i32_0 : i32, i32
  }
  func.func @transform_2(%arg0: i32) -> (i32, i32) {
    %c0_i32 = arith.constant 0 : i32
    %c0_i32_0 = arith.constant 0 : i32
    %c0_i32_1 = arith.constant 0 : i32
    return %c0_i32, %c0_i32_0 : i32, i32
  }
  func.func @transform_3(%arg0: i32) -> (i32, i32) {
    %c0_i32 = arith.constant 0 : i32
    %c0_i32_0 = arith.constant 0 : i32
    %c0_i32_1 = arith.constant 0 : i32
    return %c0_i32, %c0_i32_0 : i32, i32
  }
  func.func @transform_4(%arg0: i32) -> (i32, i32) {
    %c0_i32 = arith.constant 0 : i32
    %c0_i32_0 = arith.constant 0 : i32
    %c0_i32_1 = arith.constant 0 : i32
    return %c0_i32, %c0_i32_0 : i32, i32
  }
  func.func @transform_5(%arg0: i32) -> (i32, i32) {
    %c0_i32 = arith.constant 0 : i32
    %c0_i32_0 = arith.constant 0 : i32
    return %arg0, %c0_i32 : i32, i32
  }
}

</mosaic_0001>

<bundles_post_ra>
// kernel: tpu_custom_call.1
= control target key start
LH: loop header
LB: loop body
LE: loop exit
PB: predicated region body
PF: predicated region fallthrough
CT: control target
= control target key end

     0   :  { %v322_v3 = vmov 0.0   ;;  %vm47_vm0 = vcmask 1041408   ;;  %vm43_vm1 = vcmask 277504   ;;  %vm236_vm2 = vcmask 15360   ;;  %s493_s1 = inlined_call_operand.vmem [shape: f32[34,256], index: 1, kind: input, shape index: {}]   ;;  %s494_s3 = inlined_call_operand.vmem [shape: f32[256,2], index: 3, kind: input, shape index: {}]   ;;  %s495_s0 = inlined_call_operand.vmem [shape: f32[8,34], index: 0, kind: input, shape index: {}]   ;;  %s496_s2 = inlined_call_operand.vmem [shape: f32[1,256], index: 2, kind: input, shape index: {}]   ;;  %s497_s4 = inlined_call_operand.vmem [shape: f32[1,2], index: 4, kind: input, shape index: {}]   ;;  %s498_s5 = inlined_call_operand.vmem [shape: f32[8,2], index: 5, kind: output, shape index: {}]  }
   0x1   :  { %v22_v0 = vld [vmem:[%s493_s1 + $0x8] sm:$0xff]  ;;  %v24_v1 = vld [vmem:[%s493_s1 + $0x18] sm:$0xff]  ;;  %v21_v2 = vld [vmem:[%s493_s1] sm:$0xff]  ;;  %118 = vmatprep.mubr.f32.mxu0 %v322_v3 }
   0x2   :  { %v281_v4 = vpack.c.bf16 %v24_v1, %v22_v0  ;;  %v23_v5 = vld [vmem:[%s493_s1 + $0x10] sm:$0xff]  ;;  %v26_v6 = vld [vmem:[%s493_s1 + $0x28] sm:$0xff]  ;;  %v28_v7 = vld [vmem:[%s493_s1 + $0x38] sm:$0xff]  ;;  %v33_v0 = vlaneseq }
   0x3   :  { %v283_v8 = vpack.c.bf16 %v23_v5, %v21_v2  ;;  %v285_v9 = vpack.c.bf16 %v28_v7, %v26_v6  ;;  %v25_v10 = vld [vmem:[%s493_s1 + $0x20] sm:$0xff]  ;;  %v27_v11 = vld [vmem:[%s493_s1 + $0x30] sm:$0xff]  ;;  %v30_v14 = vld [vmem:[%s493_s1 + $0x48] sm:$0x3] }
   0x4   :  { %282 = vmatprep.subr.bf16.mxu0 %v281_v4  ;;  %v143_v12 = vld [vmem:[%s494_s3 + $0x80] sm:$0xff]  ;;  %v287_v13 = vpack.c.bf16 %v27_v11, %v25_v10  ;;  %v144_v15 = vld [vmem:[%s494_s3 + $0x88] sm:$0xff]  ;;  %v145_v20 = vld [vmem:[%s494_s3 + $0x90] sm:$0xff]  ;;  %v34_v1 = vshrl.u32 %v33_v0, 7 }
   0x5   :  { %284 = vmatpush1.bf16.msra.mxu0 %v283_v8  ;;  %v127_v16 = vld [vmem:[%s494_s3] sm:$0xff]  ;;  %v128_v17 = vld [vmem:[%s494_s3 + $0x8] sm:$0xff]  ;;  %v289_v18 = vpack.c.bf16 %v144_v15, %v143_v12  ;;  %v146_v21 = vld [vmem:[%s494_s3 + $0x98] sm:$0xff] }
   0x6   :  { %286 = vmatprep.subr.bf16.mxu0 %v285_v9  ;;  %v291_v19 = vpack.c.bf16 %v128_v17, %v127_v16  ;;  %v129_v22 = vld [vmem:[%s494_s3 + $0x10] sm:$0xff]  ;;  %v293_v23 = vpack.c.bf16 %v146_v21, %v145_v20  ;;  %v130_v24 = vld [vmem:[%s494_s3 + $0x18] sm:$0xff]  ;;  %v147_v25 = vld [vmem:[%s494_s3 + $0xa0] sm:$0xff]  ;;  %v35_v2 = vsub.s32 0, %v34_v1  ;;  %v39_v4 = vsub.s32 1, %v34_v1 }
   0x7   :  { %v148_v26 = vld [vmem:[%s494_s3 + $0xa8] sm:$0xff]  ;;  %290 = vmatprep.subr.bf16.mxu1 %v289_v18  ;;  %v295_v27 = vpack.c.bf16 %v130_v24, %v129_v22  ;;  %v29_v28 = vld [vmem:[%s493_s1 + $0x40] sm:$0x3]  ;;  %v149_v33 = vld [vmem:[%s494_s3 + $0xb0] sm:$0xff] }
   0x8   :  { %292 = vmatpush3.bf16.msra.mxu1 %v291_v19  ;;  %v297_v29 = vpack.c.bf16 %v148_v26, %v147_v25  ;;  %v131_v30 = vld [vmem:[%s494_s3 + $0x20] sm:$0xff]  ;;  %v132_v31 = vld [vmem:[%s494_s3 + $0x28] sm:$0xff]  ;;  %v150_v34 = vld [vmem:[%s494_s3 + $0xb8] sm:$0xff] }
   0x9   :  { %288 = vmatpush1.bf16.msra.mxu0 %v287_v13  ;;  %294 = vmatprep.subr.bf16.mxu1 %v293_v23  ;;  %v20_v32 = vld [vmem:[%s495_s0] sm:$0xff]  ;;  %v299_v35 = vpack.c.bf16 %v132_v31, %v131_v30  ;;  %v301_v36 = vpack.c.bf16 %v150_v34, %v149_v33  ;;  %v133_v37 = vld [vmem:[%s494_s3 + $0x30] sm:$0xff]  ;;  %v134_v38 = vld [vmem:[%s494_s3 + $0x38] sm:$0xff] }
   0xa   :  { %242 = vmatprep.subr.msk.mxu0 %vm47_vm0, %v30_v14  ;;  %v151_v39 = vld [vmem:[%s494_s3 + $0xc0] sm:$0xff]  ;;  %v152_v40 = vld [vmem:[%s494_s3 + $0xc8] sm:$0xff]  ;;  %v303_v41 = vpack.c.bf16 %v134_v38, %v133_v37  ;;  %v153_v45 = vld [vmem:[%s494_s3 + $0xd0] sm:$0xff] }
   0xb   :  { %v305_v42 = vpack.c.bf16 %v152_v40, %v151_v39  ;;  %v135_v43 = vld [vmem:[%s494_s3 + $0x40] sm:$0xff]  ;;  %v136_v44 = vld [vmem:[%s494_s3 + $0x48] sm:$0xff]  ;;  %v154_v46 = vld [vmem:[%s494_s3 + $0xd8] sm:$0xff] }
   0xc   :  { %296 = vmatpush3.bf16.msra.mxu1 %v295_v27  ;;  %v307_v47 = vpack.c.bf16 %v136_v44, %v135_v43  ;;  %v309_v48 = vpack.c.bf16 %v154_v46, %v153_v45  ;;  %v137_v49 = vld [vmem:[%s494_s3 + $0x50] sm:$0xff]  ;;  %v138_v50 = vld [vmem:[%s494_s3 + $0x58] sm:$0xff]  ;;  %v155_v51 = vld [vmem:[%s494_s3 + $0xe0] sm:$0xff] }
   0xd   :  { %243 = vmatpush1.msk.msra.mxu0 %vm47_vm0, %v29_v28  ;;  %298 = vmatprep.subr.bf16.mxu1 %v297_v29  ;;  %v156_v52 = vld [vmem:[%s494_s3 + $0xe8] sm:$0xff]  ;;  %v311_v53 = vpack.c.bf16 %v138_v50, %v137_v49  ;;  %v139_v55 = vld [vmem:[%s494_s3 + $0x60] sm:$0xff]  ;;  %v157_v58 = vld [vmem:[%s494_s3 + $0xf0] sm:$0xff] }
   0xe   :  { %244 = vmatmul.mubr.msk.f32.vlgmr.msra.gmra.mrb[0].mxu0 %vm43_vm1, %v20_v32  ;;  %v313_v54 = vpack.c.bf16 %v156_v52, %v155_v51  ;;  %v140_v56 = vld [vmem:[%s494_s3 + $0x68] sm:$0xff]  ;;  %v158_v59 = vld [vmem:[%s494_s3 + $0xf8] sm:$0xff]  ;;  %v141_v61 = vld [vmem:[%s494_s3 + $0x70] sm:$0xff] }
   0xf   :  { %v315_v57 = vpack.c.bf16 %v140_v56, %v139_v55  ;;  %v317_v60 = vpack.c.bf16 %v158_v59, %v157_v58  ;;  %v142_v62 = vld [vmem:[%s494_s3 + $0x78] sm:$0xff]  ;;  %v31_v3 = vld [vmem:[%s496_s2] sm:$0x3] }
  0x10   :  { %300 = vmatpush3.bf16.msra.mxu1 %v299_v35  ;;  %v319_v63 = vpack.c.bf16 %v142_v62, %v141_v61  ;;  %v36_v5 = vrot.slane %v31_v3, %v35_v2  ;;  %v40_v6 = vrot.slane %v31_v3, %v39_v4  ;;  %v245_v14 = vld [vmem:[%s497_s4] ss:$0 sm:$0xff] }
  0x11   :  { %302 = vmatprep.subr.bf16.mxu1 %v301_v36 }
  0x14   :  { %304 = vmatpush3.bf16.msra.mxu1 %v303_v41 }
  0x15   :  { %306 = vmatprep.subr.bf16.mxu1 %v305_v42 }
  0x18   :  { %308 = vmatpush3.bf16.msra.mxu1 %v307_v47 }
  0x19   :  { %310 = vmatprep.subr.bf16.mxu1 %v309_v48 }
  0x1c   :  { %312 = vmatpush3.bf16.msra.mxu1 %v311_v53 }
  0x1d   :  { %314 = vmatprep.subr.bf16.mxu1 %v313_v54 }
  0x20   :  { %316 = vmatpush3.bf16.msra.mxu1 %v315_v57 }
  0x21   :  { %318 = vmatprep.subr.bf16.mxu1 %v317_v60 }
  0x24   :  { %320 = vmatpush3.bf16.msra.mxu1 %v319_v63 }
  0xe1   :  { %v120_v7 = vpop.f32.mrb[0].mxu0 }
  0xe2   :  { %v121_v8 = vadd.f32 %v120_v7, %v36_v5  ;;  %v122_v9 = vpop.f32.mrb[1].mxu0 }
  0xe3   :  { %v123_v10 = vadd.f32 %v122_v9, %v40_v6 }
  0xe4   :  { %v125_v12 = vmax.f32 %v121_v8, 0.0 }
  0xe5   :  { %v126_v11 = vmax.f32 %v123_v10, 0.0 }
  0xe7   :  { %230 = vmatprep.mubr.f32.mxu1 %v126_v11 }
  0xe8   :  { %231 = vmatmul.mubr.f32.vlgmr.msra.gmra.mrb[0].mxu1 %v125_v12 }
 0x1bb   :  { %v278_v13 = vpop.f32.mrb[0].mxu1 }
 0x1bc   :  { %v279_v15 = vpop.f32.mrb[1].mxu1 }
 0x1bd   :  { %v280_v16 = vadd.f32 %v279_v15, %v278_v13 }
 0x1bf   :  { %v233_v17 = vadd.f32 %v280_v16, %v245_v14 }
 0x1c1   :  { %237 = vst.msk [vmem:[%s498_s5] sm:$0xff] %vm236_vm2, %v233_v17 }

</bundles_post_ra>
